<compile_context>
chip_gen: v7x
topology: tpu7x:2x2x1
jax: 0.10.0
libtpu: 0.0.40
codegen_flags: <defaults>
</compile_context>

<pallas_src>
import functools

import jax
import jax.numpy as jnp
from jax import lax
from jax.experimental import pallas as pl
from jax.experimental.pallas import tpu as pltpu

_EPS = 1e-5   # PyTorch BatchNorm1d default eps


# --------------------------------------------------------------------------- #
# Kernels
# --------------------------------------------------------------------------- #
def _conv1_stats_kernel(x_ref, w_ref, y_ref, st_ref, *, G, K, L):
    """conv1 (no bias) via one im2col matmul + partial BN1 stats.

    x_ref : (G, L + 2P, C) bf16   per-sample zero-padded, channels-last
    w_ref : (K*C, O)       bf16   im2col-reshaped conv1 weight
    y_ref : (G, L, O)      bf16
    st_ref: (1, 2, O)      f32    row0 = sum, row1 = sum of squares
    """
    O = y_ref.shape[-1]
    KC = w_ref.shape[0]
    x = x_ref[...]                                           # (G, L+2P, C)
    if K > 1:
        a = jnp.concatenate([x[:, k:k + L, :] for k in range(K)], axis=-1)
    else:
        a = x[:, :L, :]
    acc = jnp.dot(a.reshape(G * L, KC), w_ref[...],
                  preferred_element_type=jnp.float32)        # (G*L, O)
    y_ref[...] = acc.reshape(G, L, O).astype(y_ref.dtype)
    # Zero-padded batch samples contribute exactly zero here -> no masking.
    st_ref[0, 0:1, :] = jnp.sum(acc, axis=0, keepdims=True)
    st_ref[0, 1:2, :] = jnp.sum(acc * acc, axis=0, keepdims=True)


def _bn_relu_conv2_stats_kernel(y1_ref, aff_ref, w_ref, y2_ref, st_ref, *,
                                G, K, L, P, n_real, mask_pad):
    """Folded BN1 FMA + ReLU + conv2 (im2col matmul) + partial BN2 stats.

    y1_ref : (G, L, O)  bf16      aff_ref: (2, O) f32  (scale; shift)
    w_ref  : (K*O, O)   bf16
    y2_ref : (G, L, O)  bf16      st_ref : (1, 2, O) f32
    """
    O = y2_ref.shape[-1]
    KO = w_ref.shape[0]
    scale = aff_ref[0:1, :]
    shift = aff_ref[1:2, :]
    h = jnp.maximum(y1_ref[...].astype(jnp.float32) * scale + shift, 0.0)
    if mask_pad:
        # Zero batch-padding samples so they don't pollute BN2 statistics.
        sidx = lax.broadcasted_iota(jnp.int32, (G, 1, 1), 0) + pl.program_id(0) * G
        h = jnp.where(sidx < n_real, h, 0.0)
    h = h.astype(w_ref.dtype)
    if P > 0:  # zero rows provide conv2's 'same' padding
        z = jnp.zeros((G, P, O), h.dtype)
        hp = jnp.concatenate([z, h, z], axis=1)              # (G, L+2P, O)
    else:
        hp = h
    if K > 1:
        a = jnp.concatenate([hp[:, k:k + L, :] for k in range(K)], axis=-1)
    else:
        a = hp[:, :L, :]
    acc = jnp.dot(a.reshape(G * L, KO), w_ref[...],
                  preferred_element_type=jnp.float32)        # (G*L, O)
    y2_ref[...] = acc.reshape(G, L, O).astype(y2_ref.dtype)
    st_ref[0, 0:1, :] = jnp.sum(acc, axis=0, keepdims=True)
    st_ref[0, 1:2, :] = jnp.sum(acc * acc, axis=0, keepdims=True)


def _bn_residual_relu_kernel(y2_ref, aff_ref, res_ref, out_ref):
    """Folded BN2 FMA + identity residual + final ReLU (memory-bound)."""
    scale = aff_ref[0:1, :]
    shift = aff_ref[1:2, :]
    y = y2_ref[...].astype(jnp.float32) * scale + shift + res_ref[...]
    out_ref[...] = jnp.maximum(y, 0.0).astype(out_ref.dtype)


# --------------------------------------------------------------------------- #
# Wrapper
# --------------------------------------------------------------------------- #
def cnn_residual_block(x, params, *, kernel_size, stride=1, padding=0):
    """Forward pass of CNNResidualBlock.  x: (N, C, L) float32, NCL layout."""
    N, C, L = x.shape
    K, P, S = kernel_size, padding, stride
    O = params["w1"].shape[0]
    if S != 1 or C != O or K != 2 * P + 1:
        # TODO(synk): projected shortcut branch (Conv1d k=1, stride*2, no bias
        # + BN); the PyTorch module only adds shape-consistently in the
        # identity-shortcut configuration implemented here.
        raise NotImplementedError(
            "only stride=1, in_channels==out_channels, 'same' conv supported")

    f32, bf16 = jnp.float32, jnp.bfloat16

    # ---- generation-aware block sizing --------------------------------------
    try:
        vmem_cap = int(getattr(pltpu.get_tpu_info(), "vmem_capacity_bytes",
                               64 * 1024 * 1024))
    except Exception:  # conservative default = v7x per-core VMEM
        vmem_cap = 64 * 1024 * 1024
    vmem_limit = int(max(32 << 20, min(100 << 20, vmem_cap * 3 // 4)))

    # Rough per-sample VMEM footprint of the heaviest pass (double-buffered
    # in/out blocks + im2col operand + f32 accumulator).
    bytes_p1 = 2 * 2 * ((L + 2 * P) * C + L * O) + 2 * L * K * C + 4 * L * O
    bytes_p2 = 2 * 2 * (2 * L * O) + 2 * (L + 2 * P) * O + 2 * L * K * O + 4 * L * O
    bytes_p3 = 2 * (2 * L * O + 4 * L * C + 4 * L * O)
    per_sample = max(bytes_p1, bytes_p2, bytes_p3, 1)
    w_bytes = 2 * K * C * O + 2 * K * O * O
    g_vmem = max(1, (vmem_limit // 2 - w_bytes) // per_sample)
    g_par = max(1, N // 8)          # keep >= 8 grid steps when the batch allows
    G = int(max(1, min(N, g_vmem, g_par)))
    nblk = pl.cdiv(N, G)
    n_pad = nblk * G                # batch padded so the grid tiles it exactly
    # TODO(synk): additionally tile the length dim for very long sequences /
    # tiny batches (currently a whole sample must fit in VMEM).

    # ---- layout glue (true channel counts, channels-last) --------------------
    x_nlc = jnp.transpose(x, (0, 2, 1))                                  # (N, L, C)
    x_res = jnp.pad(x_nlc, ((0, n_pad - N), (0, 0), (0, 0)))             # f32 residual
    xp = jnp.pad(x_nlc, ((0, n_pad - N), (P, P), (0, 0))).astype(bf16)   # (n_pad, L+2P, C)
    # im2col weights: W[k*Cin + c, o] = w[o, c, k]
    w1 = jnp.transpose(params["w1"], (2, 1, 0)).reshape(K * C, O).astype(bf16)
    w2 = jnp.transpose(params["w2"], (2, 1, 0)).reshape(K * O, O).astype(bf16)
    g1, be1 = params["g1"].astype(f32), params["be1"].astype(f32)
    g2, be2 = params["g2"].astype(f32), params["be2"].astype(f32)
    # NOTE: conv biases b1/b2 are intentionally unused -- training-mode BN
    # subtracts the batch mean, so per-channel conv biases cancel exactly.
    # TODO(synk): re-add them if eval-mode BN (running stats) is ever needed.

    cparams = pltpu.CompilerParams(
        dimension_semantics=("parallel",), vmem_limit_bytes=vmem_limit)

    n_valid = float(N * L)

    def _affine(st, gamma, beta):
        # Combine per-block partial sums, fold BN into one (scale, shift) pair.
        # TODO(synk): two-pass variance for very large N*L if precision matters.
        mean = jnp.sum(st[:, 0, :], axis=0) / n_valid
        var = jnp.maximum(jnp.sum(st[:, 1, :], axis=0) / n_valid - mean * mean, 0.0)
        scale = gamma * lax.rsqrt(var + _EPS)
        shift = beta - mean * scale
        return jnp.stack([scale, shift]).astype(f32)          # (2, O)

    # ---- pass 1: conv1 + partial BN1 stats -----------------------------------
    y1, st1 = pl.pallas_call(
        functools.partial(_conv1_stats_kernel, G=G, K=K, L=L),
        grid=(nblk,),
        in_specs=[
            pl.BlockSpec((G, L + 2 * P, C), lambda i: (i, 0, 0)),
            pl.BlockSpec((K * C, O), lambda i: (0, 0)),
        ],
        out_specs=(
            pl.BlockSpec((G, L, O), lambda i: (i, 0, 0)),
            pl.BlockSpec((1, 2, O), lambda i: (i, 0, 0)),
        ),
        out_shape=(
            jax.ShapeDtypeStruct((n_pad, L, O), bf16),
            jax.ShapeDtypeStruct((nblk, 2, O), f32),
        ),
        compiler_params=cparams,
    )(xp, w1)
    aff1 = _affine(st1, g1, be1)

    # ---- pass 2: BN1 + ReLU + conv2 + partial BN2 stats -----------------------
    y2, st2 = pl.pallas_call(
        functools.partial(_bn_relu_conv2_stats_kernel, G=G, K=K, L=L, P=P,
                          n_real=N, mask_pad=(n_pad != N)),
        grid=(nblk,),
        in_specs=[
            pl.BlockSpec((G, L, O), lambda i: (i, 0, 0)),
            pl.BlockSpec((2, O), lambda i: (0, 0)),
            pl.BlockSpec((K * O, O), lambda i: (0, 0)),
        ],
        out_specs=(
            pl.BlockSpec((G, L, O), lambda i: (i, 0, 0)),
            pl.BlockSpec((1, 2, O), lambda i: (i, 0, 0)),
        ),
        out_shape=(
            jax.ShapeDtypeStruct((n_pad, L, O), bf16),
            jax.ShapeDtypeStruct((nblk, 2, O), f32),
        ),
        compiler_params=cparams,
    )(y1, aff1, w2)
    aff2 = _affine(st2, g2, be2)

    # ---- pass 3: BN2 + residual + ReLU ----------------------------------------
    outp = pl.pallas_call(
        _bn_residual_relu_kernel,
        grid=(nblk,),
        in_specs=[
            pl.BlockSpec((G, L, O), lambda i: (i, 0, 0)),
            pl.BlockSpec((2, O), lambda i: (0, 0)),
            pl.BlockSpec((G, L, C), lambda i: (i, 0, 0)),
        ],
        out_specs=pl.BlockSpec((G, L, O), lambda i: (i, 0, 0)),
        out_shape=jax.ShapeDtypeStruct((n_pad, L, O), f32),
        compiler_params=cparams,
    )(y2, aff2, x_res)

    # Drop batch padding, back to PyTorch's (N, C, L) layout.
    # TODO(synk): the NLC<->NCL transposes could be folded into the kernels.
    return jnp.transpose(outp[:N], (0, 2, 1))


# --------------------------------------------------------------------------- #
# Pure-JAX reference (f32) mirroring the PyTorch forward (training-mode BN)
# --------------------------------------------------------------------------- #
def reference_forward(x, p, K, P):
    def conv1d(h, w, b):
        y = lax.conv_general_dilated(
            h, w, window_strides=(1,), padding=[(P, P)],
            dimension_numbers=("NCH", "OIH", "NCH"))
        return y + b[None, :, None]

    def bn_train(y, g, be):
        m = jnp.mean(y, axis=(0, 2), keepdims=True)
        v = jnp.mean((y - m) ** 2, axis=(0, 2), keepdims=True)
        return (y - m) / jnp.sqrt(v + _EPS) * g[None, :, None] + be[None, :, None]

    residual = x  # identity shortcut (stride=1, in_channels==out_channels)
    h = jax.nn.relu(bn_train(conv1d(x, p["w1"], p["b1"]), p["g1"], p["be1"]))
    h = bn_train(conv1d(h, p["w2"], p["b2"]), p["g2"], p["be2"])
    return jax.nn.relu(h + residual)


if __name__ == "__main__":
    N, C, L, K, P = 2, 8, 16, 3, 1
    key = jax.random.PRNGKey(0)
    ks = jax.random.split(key, 7)
    x = jax.random.normal(ks[0], (N, C, L), jnp.float32)
    params = {
        "w1": 0.3 * jax.random.normal(ks[1], (C, C, K), jnp.float32),
        "b1": 0.1 * jax.random.normal(ks[2], (C,), jnp.float32),
        "g1": 1.0 + 0.1 * jax.random.normal(ks[3], (C,), jnp.float32),
        "be1": 0.1 * jax.random.normal(ks[4], (C,), jnp.float32),
        "w2": 0.3 * jax.random.normal(ks[5], (C, C, K), jnp.float32),
        "b2": 0.1 * jax.random.normal(ks[6], (C,), jnp.float32),
        "g2": jnp.ones((C,), jnp.float32),
        "be2": jnp.zeros((C,), jnp.float32),
    }

    fwd = jax.jit(functools.partial(
        cnn_residual_block, kernel_size=K, stride=1, padding=P))
    out = jax.block_until_ready(fwd(x, params))
    assert out.shape == (N, C, L)

    ref = reference_forward(x, params, K, P)
    # bf16 MXU operands / intermediates vs. f32 reference -> relaxed tolerance.
    if not bool(jnp.allclose(out, ref, rtol=5e-2, atol=5e-2)):
        raise AssertionError(
            f"mismatch, max abs err = {float(jnp.max(jnp.abs(out - ref)))}")
    print("KERNEL_OK")
</pallas_src>

<mosaic_0001>
module attributes {stable_mosaic.version = 11 : i64} {
  func.func @_conv1_stats_kernel(%arg0: i32, %arg1: memref<1x18x8xbf16, #tpu.memory_space<vmem>>, %arg2: memref<24x8xbf16, #tpu.memory_space<vmem>>, %arg3: memref<1x16x8xbf16, #tpu.memory_space<vmem>>, %arg4: memref<1x2x8xf32, #tpu.memory_space<vmem>>) attributes {dimension_semantics = [#tpu.dimension_semantics<parallel>], iteration_bounds = array<i64: 2>, scalar_prefetch = 0 : i64, scratch_operands = 0 : i64, tpu.core_type = #tpu.core_type<tc>, window_params = [{transform_indices = @transform_0, window_bounds = array<i64: 1, 18, 8>}, {pipeline_mode = #tpu.pipeline_mode<synchronous>, transform_indices = @transform_1, window_bounds = array<i64: 24, 8>}, {transform_indices = @transform_2, window_bounds = array<i64: 1, 16, 8>}, {transform_indices = @transform_3, window_bounds = array<i64: 1, 2, 8>}]} {
    %c0 = arith.constant 0 : index
    %c0_0 = arith.constant 0 : index
    %c0_1 = arith.constant 0 : index
    %0 = vector.load %arg1[%c0, %c0_0, %c0_1] : memref<1x18x8xbf16, #tpu.memory_space<vmem>>, vector<1x18x8xbf16>
    %1 = vector.extract_strided_slice %0 {offsets = [0, 0, 0], sizes = [1, 16, 8], strides = [1, 1, 1]} : vector<1x18x8xbf16> to vector<1x16x8xbf16>
    %2 = vector.extract_strided_slice %0 {offsets = [0, 1, 0], sizes = [1, 16, 8], strides = [1, 1, 1]} : vector<1x18x8xbf16> to vector<1x16x8xbf16>
    %3 = vector.extract_strided_slice %0 {offsets = [0, 2, 0], sizes = [1, 16, 8], strides = [1, 1, 1]} : vector<1x18x8xbf16> to vector<1x16x8xbf16>
    %4 = tpu.concatenate %1, %2, %3 in 2 : vector<1x16x8xbf16>, vector<1x16x8xbf16>, vector<1x16x8xbf16> -> vector<1x16x24xbf16>
    %5 = vector.shape_cast %4 : vector<1x16x24xbf16> to vector<16x24xbf16>
    %c0_2 = arith.constant 0 : index
    %c0_3 = arith.constant 0 : index
    %6 = vector.load %arg2[%c0_2, %c0_3] : memref<24x8xbf16, #tpu.memory_space<vmem>>, vector<24x8xbf16>
    %cst = arith.constant dense<0.000000e+00> : vector<16x8xf32>
    %7 = tpu.matmul %5, %6, %cst {dimension_numbers = #tpu.dot_dimension_numbers<[1], [0], [0], [1], [0, 0, 1, 1], [], []>} : vector<16x24xbf16>, vector<24x8xbf16>, vector<16x8xf32> -> vector<16x8xf32>
    %8 = vector.shape_cast %7 : vector<16x8xf32> to vector<1x16x8xf32>
    %9 = arith.truncf %8 : vector<1x16x8xf32> to vector<1x16x8xbf16>
    %c0_4 = arith.constant 0 : index
    %c0_5 = arith.constant 0 : index
    %c0_6 = arith.constant 0 : index
    %10 = vector.load %arg3[%c0_4, %c0_5, %c0_6] : memref<1x16x8xbf16, #tpu.memory_space<vmem>>, vector<1x16x8xbf16>
    tpu.vector_store %arg3[%c0_4, %c0_5, %c0_6], %9 {strides = array<i32>} : memref<1x16x8xbf16, #tpu.memory_space<vmem>>, vector<1x16x8xbf16>,
    %cst_7 = arith.constant dense<0.000000e+00> : vector<8xf32>
    %11 = vector.multi_reduction <add>, %7, %cst_7 [0] : vector<16x8xf32> to vector<8xf32>
    %12 = vector.shape_cast %11 : vector<8xf32> to vector<1x8xf32>
    %c0_8 = arith.constant 0 : index
    %c0_9 = arith.constant 0 : index
    %c0_10 = arith.constant 0 : index
    %13 = vector.load %arg4[%c0_8, %c0_9, %c0_10] : memref<1x2x8xf32, #tpu.memory_space<vmem>>, vector<1x1x8xf32>
    %14 = vector.shape_cast %13 : vector<1x1x8xf32> to vector<1x8xf32>
    %15 = vector.shape_cast %12 : vector<1x8xf32> to vector<1x1x8xf32>
    tpu.vector_store %arg4[%c0_8, %c0_9, %c0_10], %15 {strides = array<i32>} : memref<1x2x8xf32, #tpu.memory_space<vmem>>, vector<1x1x8xf32>,
    %16 = arith.mulf %7, %7 : vector<16x8xf32>
    %cst_11 = arith.constant dense<0.000000e+00> : vector<8xf32>
    %17 = vector.multi_reduction <add>, %16, %cst_11 [0] : vector<16x8xf32> to vector<8xf32>
    %18 = vector.shape_cast %17 : vector<8xf32> to vector<1x8xf32>
    %c0_12 = arith.constant 0 : index
    %c1 = arith.constant 1 : index
    %c0_13 = arith.constant 0 : index
    %19 = vector.load %arg4[%c0_12, %c1, %c0_13] : memref<1x2x8xf32, #tpu.memory_space<vmem>>, vector<1x1x8xf32>
    %20 = vector.shape_cast %19 : vector<1x1x8xf32> to vector<1x8xf32>
    %21 = vector.shape_cast %18 : vector<1x8xf32> to vector<1x1x8xf32>
    tpu.vector_store %arg4[%c0_12, %c1, %c0_13], %21 {strides = array<i32>} : memref<1x2x8xf32, #tpu.memory_space<vmem>>, vector<1x1x8xf32>,
    return
  }
  func.func @transform_0(%arg0: i32) -> (i32, i32, i32) {
    %c0_i32 = arith.constant 0 : i32
    %c0_i32_0 = arith.constant 0 : i32
    %c0_i32_1 = arith.constant 0 : i32
    return %arg0, %c0_i32, %c0_i32_0 : i32, i32, i32
  }
  func.func @transform_1(%arg0: i32) -> (i32, i32) {
    %c0_i32 = arith.constant 0 : i32
    %c0_i32_0 = arith.constant 0 : i32
    %c0_i32_1 = arith.constant 0 : i32
    return %c0_i32, %c0_i32_0 : i32, i32
  }
  func.func @transform_2(%arg0: i32) -> (i32, i32, i32) {
    %c0_i32 = arith.constant 0 : i32
    %c0_i32_0 = arith.constant 0 : i32
    %c0_i32_1 = arith.constant 0 : i32
    return %arg0, %c0_i32, %c0_i32_0 : i32, i32, i32
  }
  func.func @transform_3(%arg0: i32) -> (i32, i32, i32) {
    %c0_i32 = arith.constant 0 : i32
    %c0_i32_0 = arith.constant 0 : i32
    %c0_i32_1 = arith.constant 0 : i32
    return %arg0, %c0_i32, %c0_i32_0 : i32, i32, i32
  }
}

module attributes {stable_mosaic.version = 11 : i64} {
  func.func @_bn_residual_relu_kernel(%arg0: i32, %arg1: memref<1x16x8xbf16, #tpu.memory_space<vmem>>, %arg2: memref<2x8xf32, #tpu.memory_space<vmem>>, %arg3: memref<1x16x8xf32, #tpu.memory_space<vmem>>, %arg4: memref<1x16x8xf32, #tpu.memory_space<vmem>>) attributes {dimension_semantics = [#tpu.dimension_semantics<parallel>], iteration_bounds = array<i64: 2>, scalar_prefetch = 0 : i64, scratch_operands = 0 : i64, tpu.core_type = #tpu.core_type<tc>, window_params = [{transform_indices = @transform_0, window_bounds = array<i64: 1, 16, 8>}, {pipeline_mode = #tpu.pipeline_mode<synchronous>, transform_indices = @transform_1, window_bounds = array<i64: 2, 8>}, {transform_indices = @transform_2, window_bounds = array<i64: 1, 16, 8>}, {transform_indices = @transform_3, window_bounds = array<i64: 1, 16, 8>}]} {
    %c0 = arith.constant 0 : index
    %c0_0 = arith.constant 0 : index
    %0 = vector.load %arg2[%c0, %c0_0] : memref<2x8xf32, #tpu.memory_space<vmem>>, vector<1x8xf32>
    %c1 = arith.constant 1 : index
    %c0_1 = arith.constant 0 : index
    %1 = vector.load %arg2[%c1, %c0_1] : memref<2x8xf32, #tpu.memory_space<vmem>>, vector<1x8xf32>
    %c0_2 = arith.constant 0 : index
    %c0_3 = arith.constant 0 : index
    %c0_4 = arith.constant 0 : index
    %2 = vector.load %arg1[%c0_2, %c0_3, %c0_4] : memref<1x16x8xbf16, #tpu.memory_space<vmem>>, vector<1x16x8xbf16>
    %3 = arith.extf %2 : vector<1x16x8xbf16> to vector<1x16x8xf32>
    %4 = vector.shape_cast %0 : vector<1x8xf32> to vector<1x1x8xf32>
    %5 = vector.broadcast %4 : vector<1x1x8xf32> to vector<1x16x8xf32>
    %6 = arith.mulf %3, %5 : vector<1x16x8xf32>
    %7 = vector.shape_cast %1 : vector<1x8xf32> to vector<1x1x8xf32>
    %8 = vector.broadcast %7 : vector<1x1x8xf32> to vector<1x16x8xf32>
    %9 = arith.addf %6, %8 : vector<1x16x8xf32>
    %c0_5 = arith.constant 0 : index
    %c0_6 = arith.constant 0 : index
    %c0_7 = arith.constant 0 : index
    %10 = vector.load %arg3[%c0_5, %c0_6, %c0_7] : memref<1x16x8xf32, #tpu.memory_space<vmem>>, vector<1x16x8xf32>
    %11 = arith.addf %9, %10 : vector<1x16x8xf32>
    %cst = arith.constant 0.000000e+00 : f32
    %12 = vector.broadcast %cst : f32 to vector<1x16x8xf32>
    %13 = arith.maximumf %11, %12 : vector<1x16x8xf32>
    %c0_8 = arith.constant 0 : index
    %c0_9 = arith.constant 0 : index
    %c0_10 = arith.constant 0 : index
    %14 = vector.load %arg4[%c0_8, %c0_9, %c0_10] : memref<1x16x8xf32, #tpu.memory_space<vmem>>, vector<1x16x8xf32>
    tpu.vector_store %arg4[%c0_8, %c0_9, %c0_10], %13 {strides = array<i32>} : memref<1x16x8xf32, #tpu.memory_space<vmem>>, vector<1x16x8xf32>,
    return
  }
  func.func @transform_0(%arg0: i32) -> (i32, i32, i32) {
    %c0_i32 = arith.constant 0 : i32
    %c0_i32_0 = arith.constant 0 : i32
    %c0_i32_1 = arith.constant 0 : i32
    return %arg0, %c0_i32, %c0_i32_0 : i32, i32, i32
  }
  func.func @transform_1(%arg0: i32) -> (i32, i32) {
    %c0_i32 = arith.constant 0 : i32
    %c0_i32_0 = arith.constant 0 : i32
    %c0_i32_1 = arith.constant 0 : i32
    return %c0_i32, %c0_i32_0 : i32, i32
  }
  func.func @transform_2(%arg0: i32) -> (i32, i32, i32) {
    %c0_i32 = arith.constant 0 : i32
    %c0_i32_0 = arith.constant 0 : i32
    %c0_i32_1 = arith.constant 0 : i32
    return %arg0, %c0_i32, %c0_i32_0 : i32, i32, i32
  }
  func.func @transform_3(%arg0: i32) -> (i32, i32, i32) {
    %c0_i32 = arith.constant 0 : i32
    %c0_i32_0 = arith.constant 0 : i32
    %c0_i32_1 = arith.constant 0 : i32
    return %arg0, %c0_i32, %c0_i32_0 : i32, i32, i32
  }
}

module attributes {stable_mosaic.version = 11 : i64} {
  func.func @_bn_relu_conv2_stats_kernel(%arg0: i32, %arg1: memref<1x16x8xbf16, #tpu.memory_space<vmem>>, %arg2: memref<2x8xf32, #tpu.memory_space<vmem>>, %arg3: memref<24x8xbf16, #tpu.memory_space<vmem>>, %arg4: memref<1x16x8xbf16, #tpu.memory_space<vmem>>, %arg5: memref<1x2x8xf32, #tpu.memory_space<vmem>>) attributes {dimension_semantics = [#tpu.dimension_semantics<parallel>], iteration_bounds = array<i64: 2>, scalar_prefetch = 0 : i64, scratch_operands = 0 : i64, tpu.core_type = #tpu.core_type<tc>, window_params = [{transform_indices = @transform_0, window_bounds = array<i64: 1, 16, 8>}, {pipeline_mode = #tpu.pipeline_mode<synchronous>, transform_indices = @transform_1, window_bounds = array<i64: 2, 8>}, {pipeline_mode = #tpu.pipeline_mode<synchronous>, transform_indices = @transform_2, window_bounds = array<i64: 24, 8>}, {transform_indices = @transform_3, window_bounds = array<i64: 1, 16, 8>}, {transform_indices = @transform_4, window_bounds = array<i64: 1, 2, 8>}]} {
    %c0 = arith.constant 0 : index
    %c0_0 = arith.constant 0 : index
    %0 = vector.load %arg2[%c0, %c0_0] : memref<2x8xf32, #tpu.memory_space<vmem>>, vector<1x8xf32>
    %c1 = arith.constant 1 : index
    %c0_1 = arith.constant 0 : index
    %1 = vector.load %arg2[%c1, %c0_1] : memref<2x8xf32, #tpu.memory_space<vmem>>, vector<1x8xf32>
    %c0_2 = arith.constant 0 : index
    %c0_3 = arith.constant 0 : index
    %c0_4 = arith.constant 0 : index
    %2 = vector.load %arg1[%c0_2, %c0_3, %c0_4] : memref<1x16x8xbf16, #tpu.memory_space<vmem>>, vector<1x16x8xbf16>
    %3 = arith.extf %2 : vector<1x16x8xbf16> to vector<1x16x8xf32>
    %4 = vector.shape_cast %0 : vector<1x8xf32> to vector<1x1x8xf32>
    %5 = vector.broadcast %4 : vector<1x1x8xf32> to vector<1x16x8xf32>
    %6 = arith.mulf %3, %5 : vector<1x16x8xf32>
    %7 = vector.shape_cast %1 : vector<1x8xf32> to vector<1x1x8xf32>
    %8 = vector.broadcast %7 : vector<1x1x8xf32> to vector<1x16x8xf32>
    %9 = arith.addf %6, %8 : vector<1x16x8xf32>
    %cst = arith.constant 0.000000e+00 : f32
    %10 = vector.broadcast %cst : f32 to vector<1x16x8xf32>
    %11 = arith.maximumf %9, %10 : vector<1x16x8xf32>
    %12 = arith.truncf %11 : vector<1x16x8xf32> to vector<1x16x8xbf16>
    %cst_5 = arith.constant 0.000000e+00 : bf16
    %13 = vector.broadcast %cst_5 : bf16 to vector<1x1x8xbf16>
    %14 = tpu.concatenate %13, %12, %13 in 1 : vector<1x1x8xbf16>, vector<1x16x8xbf16>, vector<1x1x8xbf16> -> vector<1x18x8xbf16>
    %15 = vector.extract_strided_slice %14 {offsets = [0, 0, 0], sizes = [1, 16, 8], strides = [1, 1, 1]} : vector<1x18x8xbf16> to vector<1x16x8xbf16>
    %16 = vector.extract_strided_slice %14 {offsets = [0, 1, 0], sizes = [1, 16, 8], strides = [1, 1, 1]} : vector<1x18x8xbf16> to vector<1x16x8xbf16>
    %17 = vector.extract_strided_slice %14 {offsets = [0, 2, 0], sizes = [1, 16, 8], strides = [1, 1, 1]} : vector<1x18x8xbf16> to vector<1x16x8xbf16>
    %18 = tpu.concatenate %15, %16, %17 in 2 : vector<1x16x8xbf16>, vector<1x16x8xbf16>, vector<1x16x8xbf16> -> vector<1x16x24xbf16>
    %19 = vector.shape_cast %18 : vector<1x16x24xbf16> to vector<16x24xbf16>
    %c0_6 = arith.constant 0 : index
    %c0_7 = arith.constant 0 : index
    %20 = vector.load %arg3[%c0_6, %c0_7] : memref<24x8xbf16, #tpu.memory_space<vmem>>, vector<24x8xbf16>
    %cst_8 = arith.constant dense<0.000000e+00> : vector<16x8xf32>
    %21 = tpu.matmul %19, %20, %cst_8 {dimension_numbers = #tpu.dot_dimension_numbers<[1], [0], [0], [1], [0, 0, 1, 1], [], []>} : vector<16x24xbf16>, vector<24x8xbf16>, vector<16x8xf32> -> vector<16x8xf32>
    %22 = vector.shape_cast %21 : vector<16x8xf32> to vector<1x16x8xf32>
    %23 = arith.truncf %22 : vector<1x16x8xf32> to vector<1x16x8xbf16>
    %c0_9 = arith.constant 0 : index
    %c0_10 = arith.constant 0 : index
    %c0_11 = arith.constant 0 : index
    %24 = vector.load %arg4[%c0_9, %c0_10, %c0_11] : memref<1x16x8xbf16, #tpu.memory_space<vmem>>, vector<1x16x8xbf16>
    tpu.vector_store %arg4[%c0_9, %c0_10, %c0_11], %23 {strides = array<i32>} : memref<1x16x8xbf16, #tpu.memory_space<vmem>>, vector<1x16x8xbf16>,
    %cst_12 = arith.constant dense<0.000000e+00> : vector<8xf32>
    %25 = vector.multi_reduction <add>, %21, %cst_12 [0] : vector<16x8xf32> to vector<8xf32>
    %26 = vector.shape_cast %25 : vector<8xf32> to vector<1x8xf32>
    %c0_13 = arith.constant 0 : index
    %c0_14 = arith.constant 0 : index
    %c0_15 = arith.constant 0 : index
    %27 = vector.load %arg5[%c0_13, %c0_14, %c0_15] : memref<1x2x8xf32, #tpu.memory_space<vmem>>, vector<1x1x8xf32>
    %28 = vector.shape_cast %27 : vector<1x1x8xf32> to vector<1x8xf32>
    %29 = vector.shape_cast %26 : vector<1x8xf32> to vector<1x1x8xf32>
    tpu.vector_store %arg5[%c0_13, %c0_14, %c0_15], %29 {strides = array<i32>} : memref<1x2x8xf32, #tpu.memory_space<vmem>>, vector<1x1x8xf32>,
    %30 = arith.mulf %21, %21 : vector<16x8xf32>
    %cst_16 = arith.constant dense<0.000000e+00> : vector<8xf32>
    %31 = vector.multi_reduction <add>, %30, %cst_16 [0] : vector<16x8xf32> to vector<8xf32>
    %32 = vector.shape_cast %31 : vector<8xf32> to vector<1x8xf32>
    %c0_17 = arith.constant 0 : index
    %c1_18 = arith.constant 1 : index
    %c0_19 = arith.constant 0 : index
    %33 = vector.load %arg5[%c0_17, %c1_18, %c0_19] : memref<1x2x8xf32, #tpu.memory_space<vmem>>, vector<1x1x8xf32>
    %34 = vector.shape_cast %33 : vector<1x1x8xf32> to vector<1x8xf32>
    %35 = vector.shape_cast %32 : vector<1x8xf32> to vector<1x1x8xf32>
    tpu.vector_store %arg5[%c0_17, %c1_18, %c0_19], %35 {strides = array<i32>} : memref<1x2x8xf32, #tpu.memory_space<vmem>>, vector<1x1x8xf32>,
    return
  }
  func.func @transform_0(%arg0: i32) -> (i32, i32, i32) {
    %c0_i32 = arith.constant 0 : i32
    %c0_i32_0 = arith.constant 0 : i32
    %c0_i32_1 = arith.constant 0 : i32
    return %arg0, %c0_i32, %c0_i32_0 : i32, i32, i32
  }
  func.func @transform_1(%arg0: i32) -> (i32, i32) {
    %c0_i32 = arith.constant 0 : i32
    %c0_i32_0 = arith.constant 0 : i32
    %c0_i32_1 = arith.constant 0 : i32
    return %c0_i32, %c0_i32_0 : i32, i32
  }
  func.func @transform_2(%arg0: i32) -> (i32, i32) {
    %c0_i32 = arith.constant 0 : i32
    %c0_i32_0 = arith.constant 0 : i32
    %c0_i32_1 = arith.constant 0 : i32
    return %c0_i32, %c0_i32_0 : i32, i32
  }
  func.func @transform_3(%arg0: i32) -> (i32, i32, i32) {
    %c0_i32 = arith.constant 0 : i32
    %c0_i32_0 = arith.constant 0 : i32
    %c0_i32_1 = arith.constant 0 : i32
    return %arg0, %c0_i32, %c0_i32_0 : i32, i32, i32
  }
  func.func @transform_4(%arg0: i32) -> (i32, i32, i32) {
    %c0_i32 = arith.constant 0 : i32
    %c0_i32_0 = arith.constant 0 : i32
    %c0_i32_1 = arith.constant 0 : i32
    return %arg0, %c0_i32, %c0_i32_0 : i32, i32, i32
  }
}

</mosaic_0001>

<bundles_post_ra>
// kernel: cnn_residual_block.3
= control target key start
LH: loop header
LB: loop body
LE: loop exit
PB: predicated region body
PF: predicated region fallthrough
CT: control target
= control target key end

     0   :  { %s482_s12 = smov 0   ;;  %s518_s0 = inlined_call_operand.vmem [shape: bf16[2,18,8], index: 0, kind: input, shape index: {}]   ;;  %s519_s1 = inlined_call_operand.vmem [shape: bf16[24,8], index: 1, kind: input, shape index: {}]   ;;  %s520_s2 = inlined_call_operand.vmem [shape: bf16[2,16,8], index: 2, kind: output, shape index: {0}]   ;;  %s521_s3 = inlined_call_operand.vmem [shape: f32[2,2,8], index: 3, kind: output, shape index: {1}]  }
   0x1 LB: > { %s401_s13 = sadd.s32 4294967295, %s456_s12   ;;  %p405_p0 = scmp.ge.s32.totalorder %s456_s12, 1  ;;  %s456_s12 = sphi %s482_s12, %s14_s12  }
   0x2   : > { %p140_p1 = scmp.lt.s32.totalorder %s456_s12, 3 }
   0x4   : > { %p141_p2 = pnand %p405_p0, %p140_p1 }
   0x5   : > { %p168_p3 = scmp.lt.s32.totalorder (!%p141_p2), %s401_s13, 1  ;;  %v458_v0 = vmov (!%p141_p2), 0.0   ;;  %v448_v1 = vld [vmem:[%s519_s1] sm:$0xff] (!%p141_p2)   ;;  %v449_v2 = vld [vmem:[%s519_s1 + $0x8] ss:$0 sps:$4 sm:$0xff] (!%p141_p2)   ;;  %vm236_vm0 = vcmask (!%p141_p2), 1043456  }
   0x6   : > { %144 = sbr.rel (%p141_p2) target bundleno = 377 (0x179), region = 28  ;;  %425 = vmatprep.subr.bf16.mxu0 (!%p141_p2), %v458_v0  ;;  %v238_v3 = vsel (!%p141_p2), %vm236_vm0, %v449_v2, 0  ;;  %vm459_vm1 = vmmov (!%p141_p2), 0   ;;  %vm194_vm2 = vsmask.f32 (!%p141_p2), 7424  ;;  %vm209_vm3 = vcmask (!%p141_p2), 1046528  }
   0x7   : > { %426 = vmatpush3.bf16.msra.mxu0 (!%p141_p2), %v448_v1  ;;  %429 = vmatprep.mubr.msk.bf16.mxu0 (!%p141_p2), %vm459_vm1, %v458_v0  ;;  %s460_s22 = smov (!%p141_p2), 8   ;;  %s461_s23 = smov (!%p141_p2), 16   ;;  %vm215_vm4 = vcmask (!%p141_p2), 64512   ;;  %vm218_vm5 = vcmask (!%p141_p2), 130048   ;;  %vm233_vm6 = vcmask (!%p141_p2), 195584   ;;  %vm289_vm7 = vcmask (!%p141_p2), 60416  }
   0x8   : > { %427 = vmatprep.subr.bf16.mxu0 (!%p141_p2), %v458_v0  ;;  %vm301_vm8 = vcmask (!%p141_p2), 57344  }
   0xb   : > { %428 = vmatpush3.bf16.msra.mxu0 (!%p141_p2), %v238_v3 }
   0xd   : > { %s523_s13 = smov (!%p168_p3, %s401_s13), 1 }
   0xe   : > { %s433_s18 = smul.u32 12, %s523_s13  ;;  %s419_s24 = sshll.u32 %s523_s13, 3 }
   0xf   : > { %s177_s27 = scalar_lea.vmem %s520_s2, %s419_s24  ;;  %s409_s28 = sshll.u32 %s523_s13, 1 }
  0x10   : > { %s172_s21 = scalar_lea.vmem %s518_s0, %s433_s18  ;;  %s181_s4 = scalar_lea.vmem %s521_s3, %s409_s28 }
  0x11   : > { %v446_v4 = vld [vmem:[%s172_s21] sm:$0xff]   ;;  %v447_v5 = vld [vmem:[%s172_s21 + $0x8] ss:$0 sps:$4 sm:$0x11]  }
  0x12   : > { %v196_v6 = vshrl.u32 %v446_v4, 16  ;;  %v198_v7 = vshll.u32 %v446_v4, 16  ;;  %v203_v8 = vshll.u32 %v447_v5, 16  ;;  %v210_v12 = vrot.slane %v446_v4, 1 }
  0x13   : > { %v211_v13 = vrot.slane %v447_v5, 1 }
  0x14   : > { %v200_v9 = vrot.slane %v198_v7, 1  ;;  %v205_v10 = vrot.slane %v203_v8, 1 }
  0x15   : > { %v212_v15 = vsel %vm209_vm3, %v210_v12, %v211_v13 }
  0x16   : > { %v201_v11 = vor.u32 %v200_v9, %v196_v6 }
  0x18   : > { %v206_v14 = vsel %vm194_vm2, %v201_v11, %v205_v10 }
  0x19   : > { %207 = vrot.lane.b32.xlu0 %v206_v14, %s460_s22 }
  0x1d   : > { %213 = vrot.lane.b32.xlu0 %v212_v15, %s461_s23 }
  0x8b   : > { %v208_v16 = vpop.permute.xlu0 %207 }
  0x8c   : > { %v217_v17 = vsel %vm215_vm4, %v446_v4, %v208_v16 }
  0x8f   : > { %v214_v18 = vpop.permute.xlu0 %213 }
  0x90   : > { %v220_v19 = vsel %vm218_vm5, %v217_v17, %v214_v18 }
  0x91   : > { %430 = vmatmul.mubr.msk.bf16.vlgmr.msra.gmra.mrb[0].mxu0 %vm233_vm6, %v220_v19 }
 0x164   : > { %v274_v20 = vpop.f32.mrb[0].mxu0 }
 0x165   : > { %v420_v21 = vpack.c.bf16 %v274_v20, %v274_v20  ;;  %v303_v22 = vmul.f32 %v274_v20, %v274_v20  ;;  %v431_v23 = vpop.f32.mrb[1].mxu0  ;;  %v292_v25 = vsel %vm215_vm4, %v274_v20, 0.0 }
 0x166   : > { %v277_v24 = vpop.f32.mrb[2].mxu0 }
 0x167   : > { %290 = vst.msk [vmem:[%s177_s27] sm:$0xf] %vm289_vm7, %v420_v21  ;;  %v421_v26 = vpack.c.bf16 %v277_v24, %v277_v24  ;;  %v293_v27 = vsel %vm215_vm4, %v277_v24, 0.0  ;;  %v304_v28 = vmul.f32 %v277_v24, %v277_v24  ;;  %v432_v29 = vpop.f32.mrb[3].mxu0  ;;  %v305_v31 = vsel %vm215_vm4, %v303_v22, 0.0 }
 0x168   : > { %v294_v30 = vadd.f32 %v293_v27, %v292_v25 }
 0x169   : > { %291 = vst.msk [vmem:[%s177_s27 + $0x4] sm:$0xf] %vm289_vm7, %v421_v26  ;;  %v306_v32 = vsel %vm215_vm4, %v304_v28, 0.0 }
 0x16a   : > { %v295_v33 = vrot.slane %v294_v30, 4  ;;  %v307_v34 = vadd.f32 %v306_v32, %v305_v31 }
 0x16c   : > { %v296_v35 = vadd.f32 %v295_v33, %v294_v30  ;;  %v308_v36 = vrot.slane %v307_v34, 4 }
 0x16e   : > { %v297_v37 = vrot.slane %v296_v35, 2  ;;  %v309_v38 = vadd.f32 %v308_v36, %v307_v34 }
 0x170   : > { %v298_v39 = vadd.f32 %v297_v37, %v296_v35  ;;  %v310_v40 = vrot.slane %v309_v38, 2 }
 0x172   : > { %v299_v41 = vrot.slane %v298_v39, 1  ;;  %v311_v42 = vadd.f32 %v310_v40, %v309_v38 }
 0x174   : > { %v300_v43 = vadd.f32 %v299_v41, %v298_v39  ;;  %v312_v44 = vrot.slane %v311_v42, 1 }
 0x176   : > { %302 = vst.msk [vmem:[%s181_s4] sm:$0x1] %vm301_vm8, %v300_v43  ;;  %v313_v45 = vadd.f32 %v312_v44, %v311_v42 }
 0x178   : > { %314 = vst.msk [vmem:[%s181_s4 + $0x1] sm:$0x1] %vm301_vm8, %v313_v45 }
 0x179 PF: > { %s14_s12 = sadd.s32 1, %s456_s12  }
 0x17a   : > { %p11_p4 = scmp.ge.s32.totalorder %s14_s12, 4  }
 0x17c   :  { %13 = sbr.rel (!%p11_p4) target bundleno = 1 (0x1), region = 70 }

// kernel: cnn_residual_block.5
= control target key start
LH: loop header
LB: loop body
LE: loop exit
PB: predicated region body
PF: predicated region fallthrough
CT: control target
= control target key end

     0   :  { %s343_s12 = smov 0   ;;  %s369_s0 = inlined_call_operand.vmem [shape: bf16[2,16,8], index: 0, kind: input, shape index: {}]   ;;  %s370_s1 = inlined_call_operand.vmem [shape: f32[2,8], index: 1, kind: input, shape index: {}]   ;;  %s371_s2 = inlined_call_operand.vmem [shape: f32[2,16,8], index: 2, kind: input, shape index: {}]   ;;  %s372_s3 = inlined_call_operand.vmem [shape: f32[2,16,8], index: 3, kind: output, shape index: {}]  }
   0x1 LB: > { %s285_s13 = sadd.s32 4294967295, %s321_s12   ;;  %p289_p0 = scmp.ge.s32.totalorder %s321_s12, 1  ;;  %s321_s12 = sphi %s343_s12, %s13_s12  }
   0x2   : > { %p147_p1 = scmp.lt.s32.totalorder %s321_s12, 3 }
   0x4   : > { %p148_p2 = pnand %p289_p0, %p147_p1 }
   0x5   : > { %p176_p3 = scmp.lt.s32.totalorder (!%p148_p2), %s285_s13, 1  ;;  %v296_v0 = vld [vmem:[%s370_s1] ss:$0 sm:$0xff] (!%p148_p2)  ;;  %v297_v4 = vld [vmem:[%s370_s1 + $0x1] ss:$0 sm:$0xff] (!%p148_p2)  ;;  %vm215_vm0 = vcmask (!%p148_p2), 64512  }
   0x6   : > { %151 = sbr.rel (%p148_p2) target bundleno = 28 (0x1c), region = 32 }
   0xd   : > { %s374_s13 = smov (!%p176_p3, %s285_s13), 1 }
   0xe   : > { %s300_s14 = sshll.u32 %s374_s13, 3  ;;  %s301_s15 = sshll.u32 %s374_s13, 4 }
   0xf   : > { %s180_s18 = scalar_lea.vmem %s369_s0, %s300_s14  ;;  %s185_s23 = scalar_lea.vmem %s371_s2, %s301_s15 }
  0x10   : > { %v304_v1 = vld [vmem:[%s180_s18] sm:$0xff]   ;;  %v210_v8 = vld [vmem:[%s185_s23 + $0x8] sm:$0xff]  ;;  %s190_s28 = scalar_lea.vmem %s372_s3, %s301_s15 }
  0x11   : > { %v305_v2 = vunpack.c.l.bf16 %v304_v1  ;;  %v306_v3 = vunpack.c.h.bf16 %v304_v1  ;;  %v209_v7 = vld [vmem:[%s185_s23] sm:$0xff] }
  0x13   : > { %v201_v5 = vmul.f32 %v305_v2, %v296_v0  ;;  %v202_v6 = vmul.f32 %v306_v3, %v296_v0 }
  0x15   : > { %v207_v9 = vadd.f32 %v297_v4, %v201_v5  ;;  %v208_v10 = vadd.f32 %v297_v4, %v202_v6 }
  0x17   : > { %v211_v11 = vadd.f32 %v209_v7, %v207_v9  ;;  %v212_v12 = vadd.f32 %v210_v8, %v208_v10 }
  0x19   : > { %v213_v13 = vmax.f32 %v211_v11, 0.0  ;;  %v214_v14 = vmax.f32 %v212_v12, 0.0 }
  0x1b   : > { %216 = vst.msk [vmem:[%s190_s28] sm:$0xff] %vm215_vm0, %v213_v13  ;;  %217 = vst.msk [vmem:[%s190_s28 + $0x8] sm:$0xff] %vm215_vm0, %v214_v14 }
  0x1c PF: > { %s13_s12 = sadd.s32 1, %s321_s12  }
  0x1d   : > { %p10_p4 = scmp.ge.s32.totalorder %s13_s12, 4  }
  0x1f   :  { %12 = sbr.rel (!%p10_p4) target bundleno = 1 (0x1), region = 65 }

// kernel: cnn_residual_block.4
= control target key start
LH: loop header
LB: loop body
LE: loop exit
PB: predicated region body
PF: predicated region fallthrough
CT: control target
= control target key end

     0   :  { %s543_s15 = smov 0   ;;  %s588_s0 = inlined_call_operand.vmem [shape: bf16[2,16,8], index: 0, kind: input, shape index: {}]   ;;  %s589_s1 = inlined_call_operand.vmem [shape: f32[2,8], index: 1, kind: input, shape index: {}]   ;;  %s590_s2 = inlined_call_operand.vmem [shape: bf16[24,8], index: 2, kind: input, shape index: {}]   ;;  %s591_s3 = inlined_call_operand.vmem [shape: bf16[2,16,8], index: 3, kind: output, shape index: {0}]   ;;  %s592_s4 = inlined_call_operand.vmem [shape: f32[2,2,8], index: 4, kind: output, shape index: {1}]  }
   0x1 LB: > { %s454_s16 = sadd.s32 4294967295, %s512_s15   ;;  %p458_p0 = scmp.ge.s32.totalorder %s512_s15, 1  ;;  %s512_s15 = sphi %s543_s15, %s15_s15  }
   0x2   : > { %p165_p1 = scmp.lt.s32.totalorder %s512_s15, 3 }
   0x4   : > { %p166_p2 = pnand %p458_p0, %p165_p1 }
   0x5   : > { %p195_p3 = scmp.lt.s32.totalorder (!%p166_p2), %s454_s16, 1  ;;  %v514_v0 = vmov (!%p166_p2), 0.0   ;;  %v504_v1 = vld [vmem:[%s590_s2] sm:$0xff] (!%p166_p2)   ;;  %vm240_vm0 = vcmask (!%p166_p2), 1040384   ;;  %vm241_vm1 = vsmask.f32 (!%p166_p2), 256 }
   0x6   : > { %169 = sbr.rel (%p166_p2) target bundleno = 393 (0x189), region = 32  ;;  %484 = vmatprep.subr.bf16.mxu0 (!%p166_p2), %v514_v0  ;;  %v464_v2 = vld [vmem:[%s589_s1] ss:$0 sm:$0xff] (!%p166_p2)  ;;  %v465_v6 = vld [vmem:[%s589_s1 + $0x1] ss:$0 sm:$0xff] (!%p166_p2)  ;;  %vm289_vm2 = vcmask (!%p166_p2), 1043456   ;;  %vm242_vm3 = vmand (!%p166_p2), %vm240_vm0, %vm241_vm1 }
   0x7   : > { %485 = vmatpush3.bf16.msra.mxu0 (!%p166_p2), %v504_v1  ;;  %v505_v16 = vld [vmem:[%s590_s2 + $0x8] ss:$0 sps:$4 sm:$0xff] (!%p166_p2)   ;;  %vm515_vm4 = vmmov (!%p166_p2), 0   ;;  %vm245_vm5 = vsmask.f32 (!%p166_p2), 7424  ;;  %vm262_vm6 = vcmask (!%p166_p2), 1046528  }
   0x8   : > { %486 = vmatprep.subr.bf16.mxu0 (!%p166_p2), %v514_v0  ;;  %v291_v18 = vsel (!%p166_p2), %vm289_vm2, %v505_v16, 0  ;;  %488 = vmatprep.mubr.msk.bf16.mxu0 (!%p166_p2), %vm515_vm4, %v514_v0  ;;  %s516_s29 = smov (!%p166_p2), 8   ;;  %s517_s30 = smov (!%p166_p2), 16   ;;  %vm268_vm7 = vcmask (!%p166_p2), 64512   ;;  %vm271_vm8 = vcmask (!%p166_p2), 130048   ;;  %vm286_vm9 = vcmask (!%p166_p2), 195584  }
   0x9   : > { %vm342_vm10 = vcmask (!%p166_p2), 60416   ;;  %vm354_vm11 = vcmask (!%p166_p2), 57344  }
   0xb   : > { %487 = vmatpush3.bf16.msra.mxu0 (!%p166_p2), %v291_v18 }
   0xd   : > { %s594_s16 = smov (!%p195_p3, %s454_s16), 1 }
   0xe   : > { %s473_s19 = sshll.u32 %s594_s16, 3  ;;  %s463_s8 = sshll.u32 %s594_s16, 1 }
   0xf   : > { %s199_s22 = scalar_lea.vmem %s588_s0, %s473_s19  ;;  %s204_s7 = scalar_lea.vmem %s591_s3, %s473_s19 }
  0x10   : > { %v478_v3 = vld [vmem:[%s199_s22] sm:$0xff]   ;;  %s208_s11 = scalar_lea.vmem %s592_s4, %s463_s8 }
  0x11   : > { %v479_v4 = vunpack.c.l.bf16 %v478_v3  ;;  %v480_v5 = vunpack.c.h.bf16 %v478_v3 }
  0x13   : > { %v220_v7 = vmul.f32 %v479_v4, %v464_v2  ;;  %v221_v8 = vmul.f32 %v480_v5, %v464_v2 }
  0x15   : > { %v226_v9 = vadd.f32 %v465_v6, %v220_v7  ;;  %v227_v10 = vadd.f32 %v465_v6, %v221_v8 }
  0x17   : > { %v228_v11 = vmax.f32 %v226_v9, 0.0  ;;  %v229_v12 = vmax.f32 %v227_v10, 0.0 }
  0x19   : > { %v230_v13 = vpack.c.bf16 %v229_v12, %v228_v11 }
  0x1b   : > { %v232_v14 = vshrl.u32 %v230_v13, 16  ;;  %v235_v15 = vshll.u32 %v230_v13, 16 }
  0x1d   : > { %v234_v17 = vrot.slane %v232_v14, 7 }
  0x1f   : > { %v237_v19 = vor.u32 %v235_v15, %v234_v17  ;;  %v244_v20 = vsel %vm242_vm3, %v234_v17, 0 }
  0x20   : > { %v254_v21 = vshll.u32 %v244_v20, 16  ;;  %v264_v29 = vrot.slane %v244_v20, 1 }
  0x21   : > { %v243_v22 = vsel %vm242_vm3, 0, %v237_v19 }
  0x22   : > { %v247_v23 = vshrl.u32 %v243_v22, 16  ;;  %v249_v24 = vshll.u32 %v243_v22, 16  ;;  %v256_v26 = vrot.slane %v254_v21, 1  ;;  %v263_v28 = vrot.slane %v243_v22, 1 }
  0x24   : > { %v251_v25 = vrot.slane %v249_v24, 1  ;;  %v265_v31 = vsel %vm262_vm6, %v263_v28, %v264_v29 }
  0x26   : > { %v252_v27 = vor.u32 %v251_v25, %v247_v23 }
  0x28   : > { %v257_v30 = vsel %vm245_vm5, %v252_v27, %v256_v26 }
  0x29   : > { %258 = vrot.lane.b32.xlu0 %v257_v30, %s516_s29 }
  0x2d   : > { %266 = vrot.lane.b32.xlu0 %v265_v31, %s517_s30 }
  0x9b   : > { %v259_v32 = vpop.permute.xlu0 %258 }
  0x9c   : > { %v270_v33 = vsel %vm268_vm7, %v243_v22, %v259_v32 }
  0x9f   : > { %v267_v34 = vpop.permute.xlu0 %266 }
  0xa0   : > { %v273_v35 = vsel %vm271_vm8, %v270_v33, %v267_v34 }
  0xa1   : > { %489 = vmatmul.mubr.msk.bf16.vlgmr.msra.gmra.mrb[0].mxu0 %vm286_vm9, %v273_v35 }
 0x174   : > { %v327_v36 = vpop.f32.mrb[0].mxu0 }
 0x175   : > { %v475_v37 = vpack.c.bf16 %v327_v36, %v327_v36  ;;  %v356_v38 = vmul.f32 %v327_v36, %v327_v36  ;;  %v490_v39 = vpop.f32.mrb[1].mxu0  ;;  %v345_v41 = vsel %vm268_vm7, %v327_v36, 0.0 }
 0x176   : > { %v330_v40 = vpop.f32.mrb[2].mxu0 }
 0x177   : > { %343 = vst.msk [vmem:[%s204_s7] sm:$0xf] %vm342_vm10, %v475_v37  ;;  %v476_v42 = vpack.c.bf16 %v330_v40, %v330_v40  ;;  %v346_v43 = vsel %vm268_vm7, %v330_v40, 0.0  ;;  %v357_v44 = vmul.f32 %v330_v40, %v330_v40  ;;  %v491_v45 = vpop.f32.mrb[3].mxu0  ;;  %v358_v47 = vsel %vm268_vm7, %v356_v38, 0.0 }
 0x178   : > { %v347_v46 = vadd.f32 %v346_v43, %v345_v41 }
 0x179   : > { %344 = vst.msk [vmem:[%s204_s7 + $0x4] sm:$0xf] %vm342_vm10, %v476_v42  ;;  %v359_v48 = vsel %vm268_vm7, %v357_v44, 0.0 }
 0x17a   : > { %v348_v49 = vrot.slane %v347_v46, 4  ;;  %v360_v50 = vadd.f32 %v359_v48, %v358_v47 }
 0x17c   : > { %v349_v51 = vadd.f32 %v348_v49, %v347_v46  ;;  %v361_v52 = vrot.slane %v360_v50, 4 }
 0x17e   : > { %v350_v53 = vrot.slane %v349_v51, 2  ;;  %v362_v54 = vadd.f32 %v361_v52, %v360_v50 }
 0x180   : > { %v351_v55 = vadd.f32 %v350_v53, %v349_v51  ;;  %v363_v56 = vrot.slane %v362_v54, 2 }
 0x182   : > { %v352_v57 = vrot.slane %v351_v55, 1  ;;  %v364_v58 = vadd.f32 %v363_v56, %v362_v54 }
 0x184   : > { %v353_v59 = vadd.f32 %v352_v57, %v351_v55  ;;  %v365_v60 = vrot.slane %v364_v58, 1 }
 0x186   : > { %355 = vst.msk [vmem:[%s208_s11] sm:$0x1] %vm354_vm11, %v353_v59  ;;  %v366_v61 = vadd.f32 %v365_v60, %v364_v58 }
 0x188   : > { %367 = vst.msk [vmem:[%s208_s11 + $0x1] sm:$0x1] %vm354_vm11, %v366_v61 }
 0x189 PF: > { %s15_s15 = sadd.s32 1, %s512_s15  }
 0x18a   : > { %p12_p4 = scmp.ge.s32.totalorder %s15_s15, 4  }
 0x18c   :  { %14 = sbr.rel (!%p12_p4) target bundleno = 1 (0x1), region = 74 }

</bundles_post_ra>
